<compile_context>
chip_gen: v7x
topology: tpu7x:2x2x1
jax: 0.10.0
libtpu: 0.0.40
codegen_flags: <defaults>
</compile_context>

<pallas_src>
import functools
import itertools

import jax
import jax.numpy as jnp
from jax.experimental import pallas as pl
from jax.experimental.pallas import tpu as pltpu

BN_EPS = 1e-5


def _round_up(x, m):
    return (x + m - 1) // m * m


# ---------------------------------------------------------------------------
# Pallas kernels
# ---------------------------------------------------------------------------
def _conv_stats_kernel(g_ref, w_ref, conv_ref, sum_ref, m2_ref, *, n_real, tm):
    """Per row tile: one deep MXU matmul + masked, centered partial BN stats."""
    i = pl.program_id(0)

    # Single deep contraction; bf16 inputs, f32 accumulation on the MXU.
    conv = jnp.dot(g_ref[...], w_ref[...],
                   preferred_element_type=jnp.float32)            # (TM, Cp) f32

    # Store only the real output channels (lane-masked store is far cheaper
    # than 16x-overpadded f32 writeback at memory-bound sizes).
    conv_ref[...] = conv[:, :conv_ref.shape[1]]

    # Centered per-tile statistics over the real rows of this tile.  Padded
    # rows are exactly zero in the input, so they contribute nothing to the
    # sum; the mask keeps them out of the centered second moment.
    row_ids = jax.lax.broadcasted_iota(jnp.int32, conv.shape, 0) + i * tm
    mask = (row_ids < n_real).astype(jnp.float32)                 # (TM, Cp)
    cnt = jnp.maximum(jnp.minimum(tm, n_real - i * tm), 1).astype(jnp.float32)

    s = jnp.sum(conv, axis=0, keepdims=True)                      # (1, Cp)
    tile_mean = s * (1.0 / cnt)
    diff = conv - tile_mean
    m2 = jnp.sum(mask * diff * diff, axis=0, keepdims=True)       # (1, Cp)

    sum_ref[...] = s.reshape(sum_ref.shape)
    m2_ref[...] = m2.reshape(m2_ref.shape)


def _bn_relu_kernel(conv_ref, scale_ref, bias_ref, o_ref):
    """Per row tile: y = conv * scale + bias, then ReLU."""
    y = conv_ref[...] * scale_ref[...] + bias_ref[...]
    o_ref[...] = jnp.maximum(y, 0.0).astype(o_ref.dtype)


# ---------------------------------------------------------------------------
# Kernel-map construction (sort-based, O(K N log N))
# ---------------------------------------------------------------------------
def _build_neighbor_index(coords, kernel_size):
    """Returns (N, K) int32 neighbor row indices; misses map to row N."""
    N = coords.shape[0]
    r = kernel_size // 2
    offsets = jnp.array(
        list(itertools.product(range(-r, r + 1), repeat=3)), dtype=jnp.int32)  # (K,3)

    batch = coords[:, 0].astype(jnp.int32)            # (N,)
    xyz = coords[:, 1:4].astype(jnp.int32)            # (N, 3)

    lo = jnp.min(xyz, axis=0) - r                     # pad extents by the kernel
    extent = jnp.max(xyz, axis=0) + r - lo + 1        # radius -> injective keys

    def encode(b, p):
        q = p - lo
        return (((b * extent[0] + q[..., 0]) * extent[1] + q[..., 1])
                * extent[2] + q[..., 2])

    keys = encode(batch, xyz)                         # (N,)
    order = jnp.argsort(keys)
    skeys = keys[order]

    qxyz = xyz[:, None, :] + offsets[None, :, :]      # (N, K, 3)
    qkeys = encode(batch[:, None], qxyz)              # (N, K)
    pos = jnp.searchsorted(skeys, qkeys)
    pos_c = jnp.minimum(pos, N - 1)
    found = skeys[pos_c] == qkeys
    return jnp.where(found, order[pos_c], N)          # miss -> zero row N


# ---------------------------------------------------------------------------
# Forward pass
# ---------------------------------------------------------------------------
def basic_convolution_block(coords, feats, weight, gamma, beta,
                            kernel_size=3, stride=1, row_tile=512):
    """MinkowskiConvolution(k=3, s=1, dim=3, bias=False) + BatchNorm + ReLU."""
    assert stride == 1, "stride=1 (default of the module) is implemented"
    N, Cin = feats.shape
    K, _, Cout = weight.shape
    assert K == kernel_size ** 3

    # ---- kernel map + bf16 gather directly into (N, K*Cin) ----
    nbr = _build_neighbor_index(coords, kernel_size)              # (N, K)
    feats_ext = jnp.concatenate(
        [feats.astype(jnp.bfloat16), jnp.zeros((1, Cin), jnp.bfloat16)], axis=0)
    gathered = feats_ext[nbr].reshape(N, K * Cin)                 # (N, K*Cin) bf16

    # ---- tiling / padding ----
    # row_tile=512 is safe for v5e's 16 MiB scoped VMEM default; bump to
    # 2048-4096 on v7x for fewer grid-step overheads if desired.
    TM = min(row_tile, _round_up(N, 16))
    Np = _round_up(N, TM)
    T = Np // TM
    KC = K * Cin
    KCp = _round_up(KC, 128)          # MXU contraction depth
    Cp = _round_up(Cout, 128)         # MXU output lanes (weight only)

    g_p = jnp.pad(gathered, ((0, Np - N), (0, KCp - KC)))
    w_p = jnp.pad(weight.reshape(KC, Cout).astype(jnp.bfloat16),
                  ((0, KCp - KC), (0, Cp - Cout)))

    cparams = pltpu.CompilerParams(
        dimension_semantics=("parallel",),
        vmem_limit_bytes=32 * 1024 * 1024)

    # ---- pass 1: tiled conv + centered partial BN statistics ----
    conv, sums, m2s = pl.pallas_call(
        functools.partial(_conv_stats_kernel, n_real=N, tm=TM),
        grid=(T,),
        in_specs=[
            pl.BlockSpec((TM, KCp), lambda i: (i, 0)),   # gathered feats (bf16)
            pl.BlockSpec((KCp, Cp), lambda i: (0, 0)),   # fused weight, resident
        ],
        out_specs=[
            pl.BlockSpec((TM, Cout), lambda i: (i, 0)),      # conv, real channels
            pl.BlockSpec((1, 1, Cp), lambda i: (i, 0, 0)),   # per-tile sum
            pl.BlockSpec((1, 1, Cp), lambda i: (i, 0, 0)),   # per-tile M2
        ],
        out_shape=[
            jax.ShapeDtypeStruct((Np, Cout), jnp.float32),
            jax.ShapeDtypeStruct((T, 1, Cp), jnp.float32),
            jax.ShapeDtypeStruct((T, 1, Cp), jnp.float32),
        ],
        compiler_params=cparams,
    )(g_p, w_p)

    # ---- tiny cross-tile combine (Chan's parallel variance, stable) ----
    counts = jnp.clip(N - jnp.arange(T) * TM, 1, TM).astype(jnp.float32)  # (T,)
    sums = sums.reshape(T, Cp)
    m2s = m2s.reshape(T, Cp)
    mean = jnp.sum(sums, axis=0) / N                                      # (Cp,)
    tile_mean = sums / counts[:, None]
    m2 = jnp.sum(m2s + counts[:, None] * (tile_mean - mean[None, :]) ** 2, axis=0)
    var = m2 / N                                                          # biased

    scale = (gamma.astype(jnp.float32)
             * jax.lax.rsqrt(var[:Cout] + BN_EPS)).reshape(1, Cout)
    bias = (beta.astype(jnp.float32) - mean[:Cout] * scale[0]).reshape(1, Cout)

    # ---- pass 2: normalize + ReLU, tiled over rows ----
    out = pl.pallas_call(
        _bn_relu_kernel,
        grid=(T,),
        in_specs=[
            pl.BlockSpec((TM, Cout), lambda i: (i, 0)),
            pl.BlockSpec((1, Cout), lambda i: (0, 0)),
            pl.BlockSpec((1, Cout), lambda i: (0, 0)),
        ],
        out_specs=pl.BlockSpec((TM, Cout), lambda i: (i, 0)),
        out_shape=jax.ShapeDtypeStruct((Np, Cout), jnp.float32),
        compiler_params=cparams,
    )(conv, scale, bias)

    return out[:N]


# ---------------------------------------------------------------------------
# Plain-JAX reference (independent all-pairs kernel map; small N only)
# ---------------------------------------------------------------------------
def _reference(coords, feats, weight, gamma, beta, kernel_size=3):
    r = kernel_size // 2
    offsets = jnp.array(
        list(itertools.product(range(-r, r + 1), repeat=3)), dtype=jnp.int32)
    batch = coords[:, 0]
    xyz = coords[:, 1:4]

    def one(off, w_k):
        target = xyz + off[None, :]
        match = jnp.all(xyz[None, :, :] == target[:, None, :], -1) & (
            batch[None, :] == batch[:, None])
        idx = jnp.argmax(match, axis=1)
        valid = jnp.any(match, axis=1).astype(feats.dtype)[:, None]
        g = (feats[idx] * valid).astype(jnp.bfloat16)
        return jnp.dot(g, w_k.astype(jnp.bfloat16),
                       preferred_element_type=jnp.float32)

    conv = jnp.sum(jax.vmap(one)(offsets, weight), axis=0)        # (N, Cout) f32
    mean = jnp.mean(conv, axis=0, keepdims=True)
    var = jnp.mean((conv - mean) ** 2, axis=0, keepdims=True)
    y = (conv - mean) * jax.lax.rsqrt(var + BN_EPS) * gamma[None, :] + beta[None, :]
    return jnp.maximum(y, 0.0)


if __name__ == "__main__":
    key = jax.random.PRNGKey(0)
    k_feat, k_w, k_g, k_b = jax.random.split(key, 4)

    # Small sparse tensor: batch=2 fully-occupied 4x4x4 grids -> N = 128 points.
    in_channels, out_channels, kernel_size = 4, 8, 3
    B, G = 2, 4
    grid_coords = jnp.array(
        list(itertools.product(range(G), repeat=3)), dtype=jnp.int32)  # (64, 3)
    coords = jnp.concatenate([
        jnp.concatenate(
            [jnp.full((G ** 3, 1), b, jnp.int32), grid_coords], axis=1)
        for b in range(B)
    ], axis=0)                                                         # (128, 4)
    N = coords.shape[0]

    feats = jax.random.normal(k_feat, (N, in_channels), jnp.float32)

    # Deterministic synthetic parameters (not a checkpoint load).
    K = kernel_size ** 3
    weight = 0.1 * jax.random.normal(
        k_w, (K, in_channels, out_channels), jnp.float32)   # Minkowski kernel layout
    gamma = 1.0 + 0.1 * jax.random.normal(k_g, (out_channels,), jnp.float32)
    beta = 0.1 * jax.random.normal(k_b, (out_channels,), jnp.float32)

    out = basic_convolution_block(coords, feats, weight, gamma, beta,
                                  kernel_size=kernel_size, stride=1)
    out = jax.block_until_ready(out)

    ref = _reference(coords, feats, weight, gamma, beta, kernel_size)
    assert out.shape == (N, out_channels)
    assert jnp.allclose(out, ref, atol=2e-3, rtol=2e-3), "mismatch vs reference"

    print("KERNEL_OK")
</pallas_src>

<mosaic_0001>
module attributes {stable_mosaic.version = 11 : i64} {
  func.func @_conv_stats_kernel(%arg0: i32, %arg1: memref<128x128xbf16, #tpu.memory_space<vmem>>, %arg2: memref<128x128xbf16, #tpu.memory_space<vmem>>, %arg3: memref<128x8xf32, #tpu.memory_space<vmem>>, %arg4: memref<1x1x128xf32, #tpu.memory_space<vmem>>, %arg5: memref<1x1x128xf32, #tpu.memory_space<vmem>>) attributes {dimension_semantics = [#tpu.dimension_semantics<parallel>], iteration_bounds = array<i64: 1>, scalar_prefetch = 0 : i64, scratch_operands = 0 : i64, tpu.core_type = #tpu.core_type<tc>, window_params = [{transform_indices = @transform_0, window_bounds = array<i64: 128, 128>}, {pipeline_mode = #tpu.pipeline_mode<synchronous>, transform_indices = @transform_1, window_bounds = array<i64: 128, 128>}, {transform_indices = @transform_2, window_bounds = array<i64: 128, 8>}, {transform_indices = @transform_3, window_bounds = array<i64: 1, 1, 128>}, {transform_indices = @transform_4, window_bounds = array<i64: 1, 1, 128>}]} {
    %c0 = arith.constant 0 : index
    %c0_0 = arith.constant 0 : index
    %0 = vector.load %arg1[%c0, %c0_0] : memref<128x128xbf16, #tpu.memory_space<vmem>>, vector<128x128xbf16>
    %c0_1 = arith.constant 0 : index
    %c0_2 = arith.constant 0 : index
    %1 = vector.load %arg2[%c0_1, %c0_2] : memref<128x128xbf16, #tpu.memory_space<vmem>>, vector<128x128xbf16>
    %cst = arith.constant dense<0.000000e+00> : vector<128x128xf32>
    %2 = tpu.matmul %0, %1, %cst {dimension_numbers = #tpu.dot_dimension_numbers<[1], [0], [0], [1], [0, 0, 1, 1], [], []>} : vector<128x128xbf16>, vector<128x128xbf16>, vector<128x128xf32> -> vector<128x128xf32>
    %3 = vector.extract_strided_slice %2 {offsets = [0, 0], sizes = [128, 8], strides = [1, 1]} : vector<128x128xf32> to vector<128x8xf32>
    %c0_3 = arith.constant 0 : index
    %c0_4 = arith.constant 0 : index
    %4 = vector.load %arg3[%c0_3, %c0_4] : memref<128x8xf32, #tpu.memory_space<vmem>>, vector<128x8xf32>
    tpu.vector_store %arg3[%c0_3, %c0_4], %3 {strides = array<i32>} : memref<128x8xf32, #tpu.memory_space<vmem>>, vector<128x8xf32>,
    %5 = tpu.iota {dimensions = array<i32: 0>} : vector<128x128xi32>
    %c128_i32 = arith.constant 128 : i32
    %6 = arith.muli %arg0, %c128_i32 : i32
    %7 = vector.broadcast %6 : i32 to vector<128x128xi32>
    %8 = arith.addi %5, %7 : vector<128x128xi32>
    %c128_i32_5 = arith.constant 128 : i32
    %9 = vector.broadcast %c128_i32_5 : i32 to vector<128x128xi32>
    %10 = arith.cmpi slt, %8, %9 : vector<128x128xi32>
    %11 = arith.extui %10 : vector<128x128xi1> to vector<128x128xi32>
    %12 = arith.sitofp %11 : vector<128x128xi32> to vector<128x128xf32>
    %c128_i32_6 = arith.constant 128 : i32
    %13 = arith.muli %arg0, %c128_i32_6 : i32
    %c128_i32_7 = arith.constant 128 : i32
    %14 = arith.subi %c128_i32_7, %13 : i32
    %c128_i32_8 = arith.constant 128 : i32
    %15 = arith.minsi %c128_i32_8, %14 : i32
    %c1_i32 = arith.constant 1 : i32
    %16 = arith.maxsi %15, %c1_i32 : i32
    %17 = arith.sitofp %16 : i32 to f32
    %cst_9 = arith.constant dense<0.000000e+00> : vector<128xf32>
    %18 = vector.multi_reduction <add>, %2, %cst_9 [0] : vector<128x128xf32> to vector<128xf32>
    %19 = vector.shape_cast %18 : vector<128xf32> to vector<1x128xf32>
    %cst_10 = arith.constant 1.000000e+00 : f32
    %20 = arith.divf %cst_10, %17 : f32
    %21 = vector.broadcast %20 : f32 to vector<1x128xf32>
    %22 = arith.mulf %19, %21 : vector<1x128xf32>
    %23 = vector.broadcast %22 : vector<1x128xf32> to vector<128x128xf32>
    %24 = arith.subf %2, %23 : vector<128x128xf32>
    %25 = arith.mulf %12, %24 : vector<128x128xf32>
    %26 = arith.mulf %25, %24 : vector<128x128xf32>
    %cst_11 = arith.constant dense<0.000000e+00> : vector<128xf32>
    %27 = vector.multi_reduction <add>, %26, %cst_11 [0] : vector<128x128xf32> to vector<128xf32>
    %28 = vector.shape_cast %27 : vector<128xf32> to vector<1x128xf32>
    %29 = vector.shape_cast %19 : vector<1x128xf32> to vector<1x1x128xf32>
    %c0_12 = arith.constant 0 : index
    %c0_13 = arith.constant 0 : index
    %c0_14 = arith.constant 0 : index
    %30 = vector.load %arg4[%c0_12, %c0_13, %c0_14] : memref<1x1x128xf32, #tpu.memory_space<vmem>>, vector<1x1x128xf32>
    tpu.vector_store %arg4[%c0_12, %c0_13, %c0_14], %29 {strides = array<i32>} : memref<1x1x128xf32, #tpu.memory_space<vmem>>, vector<1x1x128xf32>,
    %31 = vector.shape_cast %28 : vector<1x128xf32> to vector<1x1x128xf32>
    %c0_15 = arith.constant 0 : index
    %c0_16 = arith.constant 0 : index
    %c0_17 = arith.constant 0 : index
    %32 = vector.load %arg5[%c0_15, %c0_16, %c0_17] : memref<1x1x128xf32, #tpu.memory_space<vmem>>, vector<1x1x128xf32>
    tpu.vector_store %arg5[%c0_15, %c0_16, %c0_17], %31 {strides = array<i32>} : memref<1x1x128xf32, #tpu.memory_space<vmem>>, vector<1x1x128xf32>,
    return
  }
  func.func @transform_0(%arg0: i32) -> (i32, i32) {
    %c0_i32 = arith.constant 0 : i32
    %c0_i32_0 = arith.constant 0 : i32
    return %arg0, %c0_i32 : i32, i32
  }
  func.func @transform_1(%arg0: i32) -> (i32, i32) {
    %c0_i32 = arith.constant 0 : i32
    %c0_i32_0 = arith.constant 0 : i32
    %c0_i32_1 = arith.constant 0 : i32
    return %c0_i32, %c0_i32_0 : i32, i32
  }
  func.func @transform_2(%arg0: i32) -> (i32, i32) {
    %c0_i32 = arith.constant 0 : i32
    %c0_i32_0 = arith.constant 0 : i32
    return %arg0, %c0_i32 : i32, i32
  }
  func.func @transform_3(%arg0: i32) -> (i32, i32, i32) {
    %c0_i32 = arith.constant 0 : i32
    %c0_i32_0 = arith.constant 0 : i32
    %c0_i32_1 = arith.constant 0 : i32
    return %arg0, %c0_i32, %c0_i32_0 : i32, i32, i32
  }
  func.func @transform_4(%arg0: i32) -> (i32, i32, i32) {
    %c0_i32 = arith.constant 0 : i32
    %c0_i32_0 = arith.constant 0 : i32
    %c0_i32_1 = arith.constant 0 : i32
    return %arg0, %c0_i32, %c0_i32_0 : i32, i32, i32
  }
}

</mosaic_0001>

<bundles_post_ra>
// kernel: tpu_custom_call.1
= control target key start
LH: loop header
LB: loop body
LE: loop exit
PB: predicated region body
PF: predicated region fallthrough
CT: control target
= control target key end

     0   :  { %10 = vsyncpa [#allocation3], 0  ;;  %s888_s0 = inlined_call_operand.hbm [shape: bf16[128,128], index: 0, kind: input, shape index: {}]   ;;  %s889_s1 = inlined_call_operand.hbm [shape: bf16[128,128], index: 1, kind: input, shape index: {}]   ;;  %s890_s2 = inlined_call_operand.vmem [shape: f32[128,8], index: 2, kind: output, shape index: {0}]   ;;  %s891_s3 = inlined_call_operand.hbm [shape: f32[1,1,128], index: 3, kind: output, shape index: {1}]   ;;  %s892_s4 = inlined_call_operand.hbm [shape: f32[1,1,128], index: 4, kind: output, shape index: {2}]  }
   0x1   :  { %11 = vsyncpa [#allocation6], 0 }
   0x2   :  { %12 = vsyncpa [#allocation4], 0 }
   0x3   :  { %13 = vsyncpa [#allocation9], 0  ;;  %s705_s15 = smov [#allocation2]   ;;  %s609_s19 = scalar_lea.hbm %s888_s0, 1024 }
   0x4   :  { %s19_s16 = sshll.u32 %s705_s15, 4  ;;  %p610_p0 = scmp.ne.s32.totalorder %s888_s0, %s609_s19  ;;  %s20_s16 = int_to_ptr.vmem [resolvable:$true] %s19_s16 }
   0x5   :  { %p613_p1 = scmp.lt.u32.totalorder %s609_s19, %s888_s0 }
   0x7   :  { %p615_p2 = pnand %p613_p1, %p610_p0 }
   0x9   :  { %618 = shalt.err (!%p615_p2)
}
   0xa   :  { %s619_s24 = scalar_lea.vmem %s20_s16, 1024  ;;  %p624_p4 = scmp.lt.s32.totalorder %s20_s16, %s20_s16 }
   0xb   :  { %p620_p3 = scmp.ne.s32.totalorder %s20_s16, %s619_s24  ;;  %p625_p5 = scmp.lt.s32.totalorder %s619_s24, %s619_s24 }
   0xd   :  { %p626_p6 = por %p625_p5, %p624_p4 }
   0xf   :  { %p627_p7 = pnand %p626_p6, %p620_p3 }
  0x11   :  { %630 = shalt.err (!%p627_p7)
}
  0x12   :  { %s706_s25 = smov 64   ;;  %s707_s26 = smov 4  }
  0x13   :  { %25 = dma.hbm_to_vmem [thread:$0]  %s888_s0, 1024, %s20_s16, [#allocation3], %s706_s25, %s706_s25, %s707_s26  }
  0x14   :  { %s708_s29 = smov [#allocation5]   ;;  %s631_s7 = scalar_lea.hbm %s889_s1, 1024 }
  0x15   :  { %s31_s30 = sshll.u32 %s708_s29, 4  ;;  %p632_p8 = scmp.ne.s32.totalorder %s889_s1, %s631_s7  ;;  %s32_s30 = int_to_ptr.vmem [resolvable:$true] %s31_s30 }
  0x16   :  { %p635_p9 = scmp.lt.u32.totalorder %s631_s7, %s889_s1 }
  0x18   :  { %p637_p10 = pnand %p635_p9, %p632_p8 }
  0x1a   :  { %640 = shalt.err (!%p637_p10)
}
  0x1b   :  { %s641_s12 = scalar_lea.vmem %s32_s30, 1024  ;;  %p646_p12 = scmp.lt.s32.totalorder %s32_s30, %s32_s30 }
  0x1c   :  { %p642_p11 = scmp.ne.s32.totalorder %s32_s30, %s641_s12  ;;  %p647_p13 = scmp.lt.s32.totalorder %s641_s12, %s641_s12 }
  0x1e   :  { %p648_p0 = por %p647_p13, %p646_p12 }
  0x20   :  { %p649_p1 = pnand %p648_p0, %p642_p11 }
  0x22   :  { %652 = shalt.err (!%p649_p1)
}
  0x23   :  { %37 = dma.hbm_to_vmem [thread:$0]  %s889_s1, 1024, %s32_s30, [#allocation6], %s706_s25, %s706_s25, %s707_s26  }
  0x24   :  { %697 = dma.done.wait [#allocation3], 1024  }
  0x25   :  { %698 = vsyncadd [#allocation3], 4294966272 }
  0x26   :  { %699 = dma.done.wait [#allocation6], 1024  }
  0x27   :  { %700 = vsyncadd [#allocation6], 4294966272  ;;  %v593_v0 = vld [vmem:[#allocation5] sm:$0xff]   ;;  %v594_v1 = vld [vmem:[#allocation5 + $0x8] sm:$0xff]   ;;  %vm270_vm0 = vcmask 64512  }
  0x28   :  { %539 = vmatprep.subr.bf16.mxu0 %v593_v0  ;;  %571 = vmatprep.subr.bf16.mxu1 %v593_v0  ;;  %v595_v2 = vld [vmem:[#allocation5 + $0x10] sm:$0xff]   ;;  %v596_v3 = vld [vmem:[#allocation5 + $0x18] sm:$0xff]   ;;  %v601_v4 = vld [vmem:[#allocation2] sm:$0xff]  }
  0x29   :  { %540 = vmatpush3.bf16.msra.mxu0 %v593_v0  ;;  %579 = vmatpush3.bf16.msra.mxu1 %v593_v0  ;;  %v597_v5 = vld [vmem:[#allocation5 + $0x20] sm:$0xff]   ;;  %v598_v7 = vld [vmem:[#allocation5 + $0x28] sm:$0xff]   ;;  %v599_v8 = vld [vmem:[#allocation5 + $0x30] sm:$0xff]  }
  0x2a   :  { %541 = vmatprep.subr.bf16.mxu0 %v594_v1  ;;  %572 = vmatprep.subr.bf16.mxu1 %v594_v1  ;;  %v605_v6 = vld [vmem:[#allocation2 + $0x20] sm:$0xff]   ;;  %v600_v9 = vld [vmem:[#allocation5 + $0x38] sm:$0xff]   ;;  %v602_v10 = vld [vmem:[#allocation2 + $0x8] sm:$0xff]  }
  0x2b   :  { %555 = vmatprep.mubr.bf16.mxu0 %v601_v4  ;;  %563 = vmatprep.mubr.bf16.mxu1 %v605_v6  ;;  %v606_v11 = vld [vmem:[#allocation2 + $0x28] sm:$0xff]   ;;  %v603_v12 = vld [vmem:[#allocation2 + $0x10] sm:$0xff]   ;;  %v604_v14 = vld [vmem:[#allocation2 + $0x18] sm:$0xff]  }
  0x2c   :  { %v607_v13 = vld [vmem:[#allocation2 + $0x30] sm:$0xff]   ;;  %v608_v15 = vld [vmem:[#allocation2 + $0x38] sm:$0xff]  }
  0x2d   :  { %542 = vmatpush3.bf16.msra.mxu0 %v594_v1  ;;  %580 = vmatpush3.bf16.msra.mxu1 %v594_v1 }
  0x2e   :  { %543 = vmatprep.subr.bf16.mxu0 %v595_v2  ;;  %573 = vmatprep.subr.bf16.mxu1 %v595_v2 }
  0x31   :  { %544 = vmatpush3.bf16.msra.mxu0 %v595_v2  ;;  %581 = vmatpush3.bf16.msra.mxu1 %v595_v2 }
  0x32   :  { %545 = vmatprep.subr.bf16.mxu0 %v596_v3  ;;  %574 = vmatprep.subr.bf16.mxu1 %v596_v3 }
  0x35   :  { %546 = vmatpush3.bf16.msra.mxu0 %v596_v3  ;;  %582 = vmatpush3.bf16.msra.mxu1 %v596_v3 }
  0x36   :  { %547 = vmatprep.subr.bf16.mxu0 %v597_v5  ;;  %575 = vmatprep.subr.bf16.mxu1 %v597_v5 }
  0x39   :  { %548 = vmatpush3.bf16.msra.mxu0 %v597_v5  ;;  %583 = vmatpush3.bf16.msra.mxu1 %v597_v5 }
  0x3a   :  { %549 = vmatprep.subr.bf16.mxu0 %v598_v7  ;;  %576 = vmatprep.subr.bf16.mxu1 %v598_v7 }
  0x3d   :  { %550 = vmatpush3.bf16.msra.mxu0 %v598_v7  ;;  %584 = vmatpush3.bf16.msra.mxu1 %v598_v7 }
  0x3e   :  { %551 = vmatprep.subr.bf16.mxu0 %v599_v8  ;;  %577 = vmatprep.subr.bf16.mxu1 %v599_v8 }
  0x41   :  { %552 = vmatpush3.bf16.msra.mxu0 %v599_v8  ;;  %585 = vmatpush3.bf16.msra.mxu1 %v599_v8 }
  0x42   :  { %553 = vmatprep.subr.bf16.mxu0 %v600_v9  ;;  %578 = vmatprep.subr.bf16.mxu1 %v600_v9 }
  0x45   :  { %554 = vmatpush3.bf16.msra.mxu0 %v600_v9  ;;  %586 = vmatpush3.bf16.msra.mxu1 %v600_v9 }
  0x48   :  { %556 = vmatmul.mubr.bf16.vlgmr.msra.gmra.mrb[0].mxu0 %v602_v10  ;;  %564 = vmatmul.mubr.bf16.vlgmr.msra.gmra.mrb[0].mxu1 %v606_v11 }
  0x49   :  { %559 = vmatprep.mubr.bf16.mxu0 %v603_v12  ;;  %567 = vmatprep.mubr.bf16.mxu1 %v607_v13 }
  0x50   :  { %560 = vmatmul.mubr.bf16.gmra.mrb[4].mxu0 %v604_v14  ;;  %568 = vmatmul.mubr.bf16.gmra.mrb[4].mxu1 %v608_v15 }
 0x11b   :  { %v760_v16 = vpop.f32.mrb[0].mxu0  ;;  %v762_v17 = vpop.f32.mrb[0].mxu1 }
 0x11c   :  { %273 = vst.msk [vmem:[%s890_s2 + $0x10] sm:$0xff] %vm270_vm0, %v760_v16  ;;  %v769_v18 = vpop.f32.mrb[1].mxu0  ;;  %281 = vst.msk [vmem:[%s890_s2 + $0x50] sm:$0xff] %vm270_vm0, %v762_v17  ;;  %v776_v19 = vpop.f32.mrb[1].mxu1 }
 0x11d   :  { %271 = vst.msk [vmem:[%s890_s2] sm:$0xff] %vm270_vm0, %v769_v18  ;;  %v783_v20 = vpop.f32.mrb[2].mxu0  ;;  %279 = vst.msk [vmem:[%s890_s2 + $0x40] sm:$0xff] %vm270_vm0, %v776_v19  ;;  %v790_v21 = vpop.f32.mrb[2].mxu1 }
 0x11e   :  { %274 = vst.msk [vmem:[%s890_s2 + $0x18] sm:$0xff] %vm270_vm0, %v783_v20  ;;  %v210_v22 = vpop.f32.mrb[3].mxu0  ;;  %282 = vst.msk [vmem:[%s890_s2 + $0x58] sm:$0xff] %vm270_vm0, %v790_v21  ;;  %v802_v23 = vpop.f32.mrb[3].mxu1 }
 0x11f   :  { %272 = vst.msk [vmem:[%s890_s2 + $0x8] sm:$0xff] %vm270_vm0, %v210_v22  ;;  %v376_v24 = vadd.f32 %v210_v22, %v769_v18  ;;  %280 = vst.msk [vmem:[%s890_s2 + $0x48] sm:$0xff] %vm270_vm0, %v802_v23 }
 0x121   :  { %v377_v25 = vadd.f32 %v760_v16, %v376_v24 }
 0x123   :  { %v561_v26 = vpop.f32.mrb[4].mxu0  ;;  %v378_v27 = vadd.f32 %v783_v20, %v377_v25  ;;  %v816_v28 = vpop.f32.mrb[4].mxu1 }
 0x124   :  { %277 = vst.msk [vmem:[%s890_s2 + $0x30] sm:$0xff] %vm270_vm0, %v561_v26  ;;  %v223_v29 = vpop.f32.mrb[5].mxu0  ;;  %285 = vst.msk [vmem:[%s890_s2 + $0x70] sm:$0xff] %vm270_vm0, %v816_v28  ;;  %v255_v30 = vpop.f32.mrb[5].mxu1 }
 0x125   :  { %275 = vst.msk [vmem:[%s890_s2 + $0x20] sm:$0xff] %vm270_vm0, %v223_v29  ;;  %v379_v31 = vadd.f32 %v378_v27, %v223_v29  ;;  %v562_v32 = vpop.f32.mrb[6].mxu0  ;;  %283 = vst.msk [vmem:[%s890_s2 + $0x60] sm:$0xff] %vm270_vm0, %v255_v30  ;;  %v570_v33 = vpop.f32.mrb[6].mxu1 }
 0x126   :  { %278 = vst.msk [vmem:[%s890_s2 + $0x38] sm:$0xff] %vm270_vm0, %v562_v32  ;;  %v226_v34 = vpop.f32.mrb[7].mxu0  ;;  %286 = vst.msk [vmem:[%s890_s2 + $0x78] sm:$0xff] %vm270_vm0, %v570_v33  ;;  %v258_v35 = vpop.f32.mrb[7].mxu1 }
 0x127   :  { %276 = vst.msk [vmem:[%s890_s2 + $0x28] sm:$0xff] %vm270_vm0, %v226_v34  ;;  %v380_v36 = vadd.f32 %v379_v31, %v226_v34  ;;  %284 = vst.msk [vmem:[%s890_s2 + $0x68] sm:$0xff] %vm270_vm0, %v258_v35  ;;  %s709_s2 = smov [#allocation7]  }
 0x128   :  { %s481_s17 = sshll.u32 %s709_s2, 4  ;;  %s482_s17 = int_to_ptr.vmem [resolvable:$true] %s481_s17 }
 0x129   :  { %v381_v37 = vadd.f32 %v561_v26, %v380_v36  ;;  %s653_s18 = scalar_lea.vmem %s482_s17, 16  ;;  %s657_s19 = scalar_lea.vmem %s482_s17, 32 }
 0x12a   :  { %p654_p2 = scmp.ne.s32.totalorder %s482_s17, %s653_s18  ;;  %p658_p3 = scmp.lt.s32.totalorder %s482_s17, %s482_s17 }
 0x12b   :  { %v382_v38 = vadd.f32 %v562_v32, %v381_v37  ;;  %p659_p4 = scmp.lt.s32.totalorder %s657_s19, %s653_s18 }
 0x12d   :  { %v383_v39 = vadd.f32 %v382_v38, %v776_v19  ;;  %p660_p5 = por %p659_p4, %p658_p3 }
 0x12f   :  { %v384_v40 = vadd.f32 %v383_v39, %v802_v23  ;;  %p661_p6 = pnand %p660_p5, %p654_p2 }
 0x131   :  { %v385_v41 = vadd.f32 %v762_v17, %v384_v40 }
 0x133   :  { %v386_v42 = vadd.f32 %v790_v21, %v385_v41 }
 0x135   :  { %v387_v43 = vadd.f32 %v386_v42, %v255_v30 }
 0x137   :  { %v388_v44 = vadd.f32 %v387_v43, %v258_v35 }
 0x139   :  { %v389_v45 = vadd.f32 %v816_v28, %v388_v44 }
 0x13b   :  { %v390_v46 = vadd.f32 %v570_v33, %v389_v45 }
 0x13d   :  { %v391_v47 = vrot.slane %v390_v46, 4 }
 0x13f   :  { %v392_v48 = vadd.f32 %v391_v47, %v390_v46 }
 0x141   :  { %v393_v49 = vrot.slane %v392_v48, 2 }
 0x143   :  { %v394_v50 = vadd.f32 %v393_v49, %v392_v48 }
 0x145   :  { %v395_v51 = vrot.slane %v394_v50, 1 }
 0x147   :  { %v396_v52 = vadd.f32 %v395_v51, %v394_v50 }
 0x149   :  { %v401_v53 = vmul.f32 0.0078125, %v396_v52  ;;  %471 = vst [vmem:[#allocation7] sm:$0x1] %v396_v52 }
 0x14a   :  { %664 = shalt.err (!%p661_p6)
}
 0x14b   :  { %s665_s22 = scalar_lea.hbm %s891_s3, 16 }
 0x14c   :  { %p666_p7 = scmp.ne.s32.totalorder %s891_s3, %s665_s22  ;;  %p669_p8 = scmp.lt.u32.totalorder %s665_s22, %s891_s3 }
 0x14e   :  { %p671_p9 = pnand %p669_p8, %p666_p7 }
 0x150   :  { %674 = shalt.err (!%p671_p9)
}
 0x151   :  { %484 = dma.vmem_to_hbm [thread:$0]  %s482_s17, 16, %s891_s3, [#allocation4]   ;;  %v402_v54 = vsub.f32 %v769_v18, %v401_v53  ;;  %v403_v55 = vsub.f32 %v210_v22, %v401_v53  ;;  %v404_v56 = vsub.f32 %v760_v16, %v401_v53  ;;  %v405_v57 = vsub.f32 %v783_v20, %v401_v53 }
 0x152   :  { %v406_v58 = vsub.f32 %v223_v29, %v401_v53  ;;  %v407_v59 = vsub.f32 %v226_v34, %v401_v53  ;;  %v408_v60 = vsub.f32 %v561_v26, %v401_v53  ;;  %v409_v61 = vsub.f32 %v562_v32, %v401_v53  ;;  %s710_s3 = smov [#allocation8]  }
 0x153   :  { %v410_v62 = vsub.f32 %v776_v19, %v401_v53  ;;  %v411_v63 = vsub.f32 %v802_v23, %v401_v53  ;;  %v412_v0 = vsub.f32 %v762_v17, %v401_v53  ;;  %v413_v1 = vsub.f32 %v790_v21, %v401_v53  ;;  %s491_s29 = sshll.u32 %s710_s3, 4  ;;  %s492_s29 = int_to_ptr.vmem [resolvable:$true] %s491_s29 }
 0x154   :  { %v414_v2 = vsub.f32 %v255_v30, %v401_v53  ;;  %v415_v3 = vsub.f32 %v258_v35, %v401_v53  ;;  %v416_v4 = vsub.f32 %v816_v28, %v401_v53  ;;  %v417_v5 = vsub.f32 %v570_v33, %v401_v53  ;;  %s675_s30 = scalar_lea.vmem %s492_s29, 16  ;;  %s679_s5 = scalar_lea.vmem %s492_s29, 32 }
 0x155   :  { %v434_v6 = vmul.f32 %v402_v54, %v402_v54  ;;  %v435_v7 = vmul.f32 %v403_v55, %v403_v55  ;;  %v436_v8 = vmul.f32 %v404_v56, %v404_v56  ;;  %v437_v10 = vmul.f32 %v405_v57, %v405_v57  ;;  %p676_p10 = scmp.ne.s32.totalorder %s492_s29, %s675_s30  ;;  %p680_p11 = scmp.lt.s32.totalorder %s492_s29, %s492_s29 }
 0x156   :  { %v438_v12 = vmul.f32 %v406_v58, %v406_v58  ;;  %v439_v14 = vmul.f32 %v407_v59, %v407_v59  ;;  %v440_v16 = vmul.f32 %v408_v60, %v408_v60  ;;  %v441_v17 = vmul.f32 %v409_v61, %v409_v61  ;;  %p681_p12 = scmp.lt.s32.totalorder %s679_s5, %s675_s30 }
 0x157   :  { %v450_v9 = vadd.f32 %v435_v7, %v434_v6  ;;  %v442_v20 = vmul.f32 %v410_v62, %v410_v62  ;;  %v443_v22 = vmul.f32 %v411_v63, %v411_v63  ;;  %v444_v24 = vmul.f32 %v412_v0, %v412_v0 }
 0x158   :  { %v445_v26 = vmul.f32 %v413_v1, %v413_v1  ;;  %v446_v28 = vmul.f32 %v414_v2, %v414_v2  ;;  %v447_v30 = vmul.f32 %v415_v3, %v415_v3  ;;  %v448_v32 = vmul.f32 %v416_v4, %v416_v4  ;;  %p682_p13 = por %p681_p12, %p680_p11 }
 0x159   :  { %v451_v11 = vadd.f32 %v450_v9, %v436_v8  ;;  %v449_v34 = vmul.f32 %v417_v5, %v417_v5 }
 0x15a   :  { %p683_p0 = pnand %p682_p13, %p676_p10 }
 0x15b   :  { %v452_v13 = vadd.f32 %v451_v11, %v437_v10 }
 0x15d   :  { %v453_v15 = vadd.f32 %v452_v13, %v438_v12 }
 0x15f   :  { %v454_v18 = vadd.f32 %v453_v15, %v439_v14 }
 0x161   :  { %v455_v19 = vadd.f32 %v454_v18, %v440_v16 }
 0x163   :  { %v456_v21 = vadd.f32 %v455_v19, %v441_v17 }
 0x165   :  { %v457_v23 = vadd.f32 %v456_v21, %v442_v20 }
 0x167   :  { %v458_v25 = vadd.f32 %v457_v23, %v443_v22 }
 0x169   :  { %v459_v27 = vadd.f32 %v458_v25, %v444_v24 }
 0x16b   :  { %v460_v29 = vadd.f32 %v459_v27, %v445_v26 }
 0x16d   :  { %v461_v31 = vadd.f32 %v460_v29, %v446_v28 }
 0x16f   :  { %v462_v33 = vadd.f32 %v461_v31, %v447_v30 }
 0x171   :  { %v463_v35 = vadd.f32 %v462_v33, %v448_v32 }
 0x173   :  { %v464_v36 = vadd.f32 %v463_v35, %v449_v34 }
 0x175   :  { %v465_v37 = vrot.slane %v464_v36, 4 }
 0x177   :  { %v466_v38 = vadd.f32 %v465_v37, %v464_v36 }
 0x179   :  { %v467_v39 = vrot.slane %v466_v38, 2 }
 0x17b   :  { %v468_v40 = vadd.f32 %v467_v39, %v466_v38 }
 0x17d   :  { %v469_v41 = vrot.slane %v468_v40, 1 }
 0x17f   :  { %v470_v42 = vadd.f32 %v469_v41, %v468_v40 }
 0x181   :  { %472 = vst [vmem:[#allocation8] sm:$0x1] %v470_v42 }
 0x182   :  { %686 = shalt.err (!%p683_p0)
}
 0x183   :  { %s687_s8 = scalar_lea.hbm %s892_s4, 16 }
 0x184   :  { %p688_p1 = scmp.ne.s32.totalorder %s892_s4, %s687_s8  ;;  %p691_p2 = scmp.lt.u32.totalorder %s687_s8, %s892_s4 }
 0x186   :  { %p693_p3 = pnand %p691_p2, %p688_p1 }
 0x188   :  { %696 = shalt.err (!%p693_p3)
}
 0x189   :  { %494 = dma.vmem_to_hbm [thread:$0]  %s492_s29, 16, %s892_s4, [#allocation9]  }
 0x18a   :  { %701 = dma.done.wait [#allocation4], 16  }
 0x18b   :  { %702 = vsyncadd [#allocation4], 4294967280 }
 0x18c   :  { %703 = dma.done.wait [#allocation9], 16  }
 0x18d   :  { %704 = vsyncadd [#allocation9], 4294967280 }
 0x18e   :  { %503 = vsyncpa [#allocation3], 1 }
 0x18f   :  { %504 = vsyncpa [#allocation6], 1 }
 0x190   :  { %505 = vsyncpa [#allocation4], 1 }
 0x191   :  { %506 = vsyncpa [#allocation9], 1 }

</bundles_post_ra>
